<compile_context>
chip_gen: v6e
topology: v6e:2x2x1
jax: 0.10.0
libtpu: 0.0.40
codegen_flags: <defaults>
</compile_context>

<pallas_src>
from functools import partial

import jax
import jax.numpy as jnp
from jax.experimental import pallas as pl
from jax.experimental.pallas import tpu as pltpu


# ----------------------------------------------------------------------------
# Hardware-aware tile selection
# ----------------------------------------------------------------------------
def _vmem_capacity_bytes():
    try:
        info = pltpu.get_tpu_info()
        cap = getattr(info, "vmem_capacity_bytes", None)
        if cap:
            return int(cap)
    except Exception:
        pass
    return 64 * 1024 * 1024          # conservative default (v7x-sized VMEM)


def _sublane_multiple(itemsize):
    # min sublane tile: f32 -> 8, bf16 -> 16, int8/fp8 -> 32
    return {4: 8, 2: 16, 1: 32}.get(int(itemsize), 8)


def _choose_tiles(B, N, itemsize, sub, big_vmem):
    """Pick (TB, TN) obeying the (sub,128)-or-full-dim rule, byte-capped."""
    cap_bytes = (16 if big_vmem else 4) * 1024 * 1024   # per input block
    max_tn = 8192 if big_vmem else 2048                 # multiple of 128
    tn = N if N <= max_tn else max_tn                   # == N or mult of 128
    # If the fallback (non-128-multiple) path is taken, the block is widened to
    # f32 inside the kernel, so cap by f32 bytes there.
    eff_itemsize = itemsize if (tn % 128 == 0) else max(itemsize, 4)
    cap_elems = max(1, cap_bytes // eff_itemsize)
    if B * tn <= cap_elems:
        tb = B                                          # full dim -> legal
    else:
        tb = max(sub, (cap_elems // tn) // sub * sub)   # multiple of sub
    return tb, tn


# ----------------------------------------------------------------------------
# Kernel
# ----------------------------------------------------------------------------
def _make_kernel(kind, B, N, TB, TN, lane_acc):
    assert N >= 2, "unbiased variance (ddof=1) requires N >= 2"
    inv_n = 1.0 / N
    inv_nm1 = 1.0 / (N - 1)
    n_in = 2 if kind == 'VarDiv' else 1
    GN = -(-N // TN)                      # static grid extent along N
    last_n = GN - 1                       # static
    need_col_mask = (N % TN) != 0         # only possible when TN % 128 == 0
    n_chunks = TN // 128 if lane_acc else 0
    assert lane_acc or not need_col_mask

    def kernel(*refs):
        in_refs = refs[:n_in]
        out_ref = refs[n_in]              # (TB, 1) f32, per-row weights
        scratch = refs[n_in + 1:]         # per input: shift, sum, sumsq
        shifts = [scratch[3 * i] for i in range(n_in)]
        sums = [scratch[3 * i + 1] for i in range(n_in)]
        sqs = [scratch[3 * i + 2] for i in range(n_in)]

        n = pl.program_id(1)

        @pl.when(n == 0)
        def _init():
            for i in range(n_in):
                # Per-row shift (first column) for numerically-robust variance.
                shifts[i][...] = in_refs[i][:, 0:1].astype(jnp.float32)
                sums[i][...] = jnp.zeros_like(sums[i])
                sqs[i][...] = jnp.zeros_like(sqs[i])

        def _accumulate(masked):
            base = last_n * TN            # static; only used when masked
            for i in range(n_in):
                ref = in_refs[i]
                shift = shifts[i][...]
                if lane_acc:
                    s = jnp.zeros((TB, 128), jnp.float32)
                    q = jnp.zeros((TB, 128), jnp.float32)
                    for j in range(n_chunks):
                        lo = base + j * 128
                        if masked and lo >= N:
                            break         # fully-padded chunk: skip entirely
                        c = ref[:, j * 128:(j + 1) * 128].astype(jnp.float32)
                        c = c - shift
                        if masked and lo + 128 > N:   # only straddling chunk
                            lane = jax.lax.broadcasted_iota(
                                jnp.int32, (TB, 128), 1)
                            c = jnp.where(lane + lo < N, c, 0.0)
                        s = s + c
                        q = q + c * c
                    sums[i][...] += s
                    sqs[i][...] += q
                else:
                    # Single full-width tile (TN == N, N % 128 != 0): no mask.
                    x = ref[...].astype(jnp.float32) - shift
                    sums[i][...] += jnp.sum(x, axis=1, keepdims=True)
                    sqs[i][...] += jnp.sum(x * x, axis=1, keepdims=True)

        if need_col_mask:
            @pl.when(n != last_n)
            def _interior():
                _accumulate(False)

            @pl.when(n == last_n)
            def _edge():
                _accumulate(True)
        else:
            _accumulate(False)

        @pl.when(n == last_n)
        def _finalize():
            def row_var(i):
                if lane_acc:
                    s = jnp.sum(sums[i][...], axis=1, keepdims=True)
                    q = jnp.sum(sqs[i][...], axis=1, keepdims=True)
                else:
                    s = sums[i][...]
                    q = sqs[i][...]
                # shifted single-pass: var = (sum((x-c)^2) - sum(x-c)^2/n)/(n-1)
                return jnp.maximum((q - s * s * inv_n) * inv_nm1, 0.0)

            var_c = row_var(0)
            if kind == 'VarDiv':
                var_b = row_var(1)
                w = var_b / (var_c + var_b + 1e-8)
            else:  # 'Var'
                w = jax.nn.sigmoid(var_c)
            out_ref[...] = w              # padded rows are clipped on writeback

    return kernel


# ----------------------------------------------------------------------------
# pallas_call wrapper
# ----------------------------------------------------------------------------
def _amplification_weight(kind, pc, pb=None, *, block_b=None, block_n=None):
    B, N = pc.shape
    args = (pc,) if pb is None else (pc, pb)
    n_in = len(args)

    max_itemsize = max(jnp.dtype(a.dtype).itemsize for a in args)
    min_itemsize = min(jnp.dtype(a.dtype).itemsize for a in args)
    sub = _sublane_multiple(min_itemsize)

    vmem_cap = _vmem_capacity_bytes()
    big_vmem = vmem_cap >= 96 * 1024 * 1024            # v5e / v6e (128 MiB)
    tb, tn = _choose_tiles(B, N, max_itemsize, sub, big_vmem)
    if block_b is not None:
        assert block_b == B or block_b % sub == 0, \
            f"block_b must be == B or a multiple of {sub}"
        tb = block_b
    if block_n is not None:
        assert block_n == N or block_n % 128 == 0, \
            "block_n must be == N or a multiple of 128"
        tn = block_n

    lane_acc = (tn % 128) == 0
    assert lane_acc or (N % tn == 0)
    acc_w = 128 if lane_acc else 1
    grid = (pl.cdiv(B, tb), pl.cdiv(N, tn))
    kernel = _make_kernel(kind, B, N, tb, tn, lane_acc)

    in_bytes = sum(a.size * jnp.dtype(a.dtype).itemsize for a in args)
    cost = pl.CostEstimate(
        flops=4 * n_in * B * N,
        transcendentals=B if kind == 'Var' else 0,
        bytes_accessed=in_bytes + B * 4,
    )

    scratch = []
    for _ in range(n_in):
        scratch += [pltpu.VMEM((tb, 1), jnp.float32),       # per-row shift
                    pltpu.VMEM((tb, acc_w), jnp.float32),    # sum(x - c)
                    pltpu.VMEM((tb, acc_w), jnp.float32)]    # sum((x - c)^2)

    vmem_limit = (96 if big_vmem else 32) * 1024 * 1024

    out = pl.pallas_call(
        kernel,
        out_shape=jax.ShapeDtypeStruct((B, 1), jnp.float32),
        grid_spec=pltpu.PrefetchScalarGridSpec(
            num_scalar_prefetch=0,
            grid=grid,
            in_specs=[pl.BlockSpec((tb, tn), lambda b, n: (b, n))
                      for _ in range(n_in)],
            out_specs=pl.BlockSpec((tb, 1), lambda b, n: (b, 0)),
            scratch_shapes=scratch,
        ),
        compiler_params=pltpu.CompilerParams(
            dimension_semantics=("parallel", "arbitrary"),
            vmem_limit_bytes=vmem_limit,
        ),
        cost_estimate=cost,
    )(*args)
    # Tiny final mean over B per-row weights (device-side; no host sync).
    return jnp.mean(out)


@partial(jax.jit, static_argnames=("block_b", "block_n"))
def _pallas_vardiv(pc, pb, block_b=None, block_n=None):
    return _amplification_weight('VarDiv',
                                 jax.lax.stop_gradient(pc),
                                 jax.lax.stop_gradient(pb),
                                 block_b=block_b, block_n=block_n)


@partial(jax.jit, static_argnames=("block_b", "block_n"))
def _pallas_var(pc, block_b=None, block_n=None):
    return _amplification_weight('Var',
                                 jax.lax.stop_gradient(pc),
                                 block_b=block_b, block_n=block_n)


# ----------------------------------------------------------------------------
# Module port
# ----------------------------------------------------------------------------
class Amplification:
    """JAX/Pallas port of CaBiR `Amplification` (no learnable parameters)."""

    def __init__(self, config_ampl, ampl_type):
        config_ampl = dict(config_ampl)
        _ = config_ampl.pop('num_epoch')
        assert len(config_ampl) == 2, f'Invalid config_ampl: {config_ampl}'
        self.kind = config_ampl['kind']
        self.pre_epoch = config_ampl['pre_epoch']
        if self.kind.startswith('Var'):
            assert ampl_type == 'comb', (
                f'WRONG: amp={ampl_type}, kind={self.kind}, but should =comb')

    def forward(self, epoch, losses_items):
        if epoch < self.pre_epoch:
            return 0.0
        if self.kind == 'VarDiv':
            pc = jnp.asarray(losses_items['loss_CE_pc'])
            pb = jnp.asarray(losses_items['loss_CE_pb'])
            assert pc.ndim == 2 and pb.ndim == 2
            # NOTE: returns a 0-d device array; the torch `.item()` host sync
            # was removed per the perf review — pull to host only when needed.
            return _pallas_vardiv(pc, pb)
        elif self.kind == 'Var':
            pc = jnp.asarray(losses_items['loss_CE_pc'])
            assert pc.ndim == 2
            return _pallas_var(pc)
        else:
            raise ValueError(f'Invalid kind: {self.kind}')

    __call__ = forward


# ----------------------------------------------------------------------------
# Reference + self test
# ----------------------------------------------------------------------------
def _ref_vardiv(pc, pb):
    pc = jnp.asarray(pc, jnp.float32)
    pb = jnp.asarray(pb, jnp.float32)
    var_c = jnp.var(pc, axis=1, ddof=1)
    var_b = jnp.var(pb, axis=1, ddof=1)
    return float(jnp.mean(var_b / (var_c + var_b + 1e-8)))


def _ref_var(pc):
    pc = jnp.asarray(pc, jnp.float32)
    return float(jnp.mean(jax.nn.sigmoid(jnp.var(pc, axis=1, ddof=1))))


if __name__ == "__main__":
    key = jax.random.PRNGKey(0)
    k1, k2, k3, k4, k5 = jax.random.split(key, 5)

    # ---- Test 1: small comb-style square losses (batch, batch); single tile,
    #      no masking, fallback reduce path (N not a multiple of 128). ----
    B, N = 16, 16
    loss_CE_pc = jax.random.uniform(k1, (B, N), dtype=jnp.float32) * 2.0
    loss_CE_pb = jax.random.uniform(k2, (B, N), dtype=jnp.float32) * 2.0
    losses_items = {'loss_CE_pc': loss_CE_pc, 'loss_CE_pb': loss_CE_pb}

    amp_vd = Amplification(
        {'num_epoch': 10, 'kind': 'VarDiv', 'pre_epoch': 2}, ampl_type='comb')
    assert amp_vd.forward(1, losses_items) == 0.0          # epoch < pre_epoch
    w_vd = jax.block_until_ready(amp_vd.forward(5, losses_items))
    ref_vd = _ref_vardiv(loss_CE_pc, loss_CE_pb)
    assert abs(float(w_vd) - ref_vd) < 2e-5, (float(w_vd), ref_vd)

    amp_v = Amplification(
        {'num_epoch': 10, 'kind': 'Var', 'pre_epoch': 0}, ampl_type='comb')
    w_v = jax.block_until_ready(amp_v.forward(3, losses_items))
    ref_v = _ref_var(loss_CE_pc)
    assert abs(float(w_v) - ref_v) < 2e-5, (float(w_v), ref_v)

    # ---- Test 2: multi-tile pipeline, lane-accumulators, edge-column mask and
    #      partial last B-tile (B % TB != 0, N % TN != 0). ----
    B2, N2 = 40, 300
    pc2 = jax.random.uniform(k3, (B2, N2), dtype=jnp.float32) * 4.0 + 5.0
    pb2 = jax.random.uniform(k4, (B2, N2), dtype=jnp.float32) * 4.0 + 5.0
    w2 = jax.block_until_ready(_pallas_vardiv(pc2, pb2, block_b=16, block_n=128))
    ref2 = _ref_vardiv(pc2, pb2)
    assert abs(float(w2) - ref2) < 1e-4, (float(w2), ref2)

    w3 = jax.block_until_ready(_pallas_var(pc2, block_b=16, block_n=128))
    ref3 = _ref_var(pc2)
    assert abs(float(w3) - ref3) < 1e-4, (float(w3), ref3)

    # ---- Test 3: bf16 inputs (in-vreg widening, dtype-aware tiling). ----
    B3, N3 = 48, 256
    pc3 = (jax.random.uniform(k5, (B3, N3), dtype=jnp.float32) * 2.0
           ).astype(jnp.bfloat16)
    w4 = jax.block_until_ready(_pallas_var(pc3))
    ref4 = _ref_var(pc3)
    assert abs(float(w4) - ref4) < 1e-4, (float(w4), ref4)

    print("KERNEL_OK")
</pallas_src>

<mosaic_0001>
module attributes {stable_mosaic.version = 11 : i64} {
  func.func @kernel(%arg0: i32, %arg1: i32, %arg2: memref<16x16xf32, #tpu.memory_space<vmem>>, %arg3: memref<16x16xf32, #tpu.memory_space<vmem>>, %arg4: memref<16x1xf32, #tpu.memory_space<vmem>>, %arg5: memref<16x1xf32, #tpu.memory_space<vmem>>, %arg6: memref<16x1xf32, #tpu.memory_space<vmem>>, %arg7: memref<16x1xf32, #tpu.memory_space<vmem>>, %arg8: memref<16x1xf32, #tpu.memory_space<vmem>>, %arg9: memref<16x1xf32, #tpu.memory_space<vmem>>, %arg10: memref<16x1xf32, #tpu.memory_space<vmem>>) attributes {dimension_semantics = [#tpu.dimension_semantics<parallel>, #tpu.dimension_semantics<arbitrary>], iteration_bounds = array<i64: 1, 1>, scalar_prefetch = 0 : i64, scratch_operands = 6 : i64, tpu.core_type = #tpu.core_type<tc>, window_params = [{transform_indices = @transform_0, window_bounds = array<i64: 16, 16>}, {transform_indices = @transform_1, window_bounds = array<i64: 16, 16>}, {transform_indices = @transform_2, window_bounds = array<i64: 16, 1>}]} {
    %c0_i32 = arith.constant 0 : i32
    %0 = arith.cmpi eq, %arg1, %c0_i32 : i32
    %1 = arith.extui %0 : i1 to i32
    %c0_i32_0 = arith.constant 0 : i32
    %2 = arith.cmpi ne, %1, %c0_i32_0 : i32
    scf.if %2 {
      %c0_29 = arith.constant 0 : index
      %c0_30 = arith.constant 0 : index
      %36 = vector.load %arg2[%c0_29, %c0_30] : memref<16x16xf32, #tpu.memory_space<vmem>>, vector<16x1xf32>
      %c0_31 = arith.constant 0 : index
      %c0_32 = arith.constant 0 : index
      %37 = vector.load %arg5[%c0_31, %c0_32] : memref<16x1xf32, #tpu.memory_space<vmem>>, vector<16x1xf32>
      tpu.vector_store %arg5[%c0_31, %c0_32], %36 {strides = array<i32>} : memref<16x1xf32, #tpu.memory_space<vmem>>, vector<16x1xf32>,
      %cst_33 = arith.constant 0.000000e+00 : f32
      %38 = vector.broadcast %cst_33 : f32 to vector<16x1xf32>
      %c0_34 = arith.constant 0 : index
      %c0_35 = arith.constant 0 : index
      %39 = vector.load %arg6[%c0_34, %c0_35] : memref<16x1xf32, #tpu.memory_space<vmem>>, vector<16x1xf32>
      tpu.vector_store %arg6[%c0_34, %c0_35], %38 {strides = array<i32>} : memref<16x1xf32, #tpu.memory_space<vmem>>, vector<16x1xf32>,
      %cst_36 = arith.constant 0.000000e+00 : f32
      %40 = vector.broadcast %cst_36 : f32 to vector<16x1xf32>
      %c0_37 = arith.constant 0 : index
      %c0_38 = arith.constant 0 : index
      %41 = vector.load %arg7[%c0_37, %c0_38] : memref<16x1xf32, #tpu.memory_space<vmem>>, vector<16x1xf32>
      tpu.vector_store %arg7[%c0_37, %c0_38], %40 {strides = array<i32>} : memref<16x1xf32, #tpu.memory_space<vmem>>, vector<16x1xf32>,
      %c0_39 = arith.constant 0 : index
      %c0_40 = arith.constant 0 : index
      %42 = vector.load %arg3[%c0_39, %c0_40] : memref<16x16xf32, #tpu.memory_space<vmem>>, vector<16x1xf32>
      %c0_41 = arith.constant 0 : index
      %c0_42 = arith.constant 0 : index
      %43 = vector.load %arg8[%c0_41, %c0_42] : memref<16x1xf32, #tpu.memory_space<vmem>>, vector<16x1xf32>
      tpu.vector_store %arg8[%c0_41, %c0_42], %42 {strides = array<i32>} : memref<16x1xf32, #tpu.memory_space<vmem>>, vector<16x1xf32>,
      %cst_43 = arith.constant 0.000000e+00 : f32
      %44 = vector.broadcast %cst_43 : f32 to vector<16x1xf32>
      %c0_44 = arith.constant 0 : index
      %c0_45 = arith.constant 0 : index
      %45 = vector.load %arg9[%c0_44, %c0_45] : memref<16x1xf32, #tpu.memory_space<vmem>>, vector<16x1xf32>
      tpu.vector_store %arg9[%c0_44, %c0_45], %44 {strides = array<i32>} : memref<16x1xf32, #tpu.memory_space<vmem>>, vector<16x1xf32>,
      %cst_46 = arith.constant 0.000000e+00 : f32
      %46 = vector.broadcast %cst_46 : f32 to vector<16x1xf32>
      %c0_47 = arith.constant 0 : index
      %c0_48 = arith.constant 0 : index
      %47 = vector.load %arg10[%c0_47, %c0_48] : memref<16x1xf32, #tpu.memory_space<vmem>>, vector<16x1xf32>
      tpu.vector_store %arg10[%c0_47, %c0_48], %46 {strides = array<i32>} : memref<16x1xf32, #tpu.memory_space<vmem>>, vector<16x1xf32>,
    } else {
    }
    %c0 = arith.constant 0 : index
    %c0_1 = arith.constant 0 : index
    %3 = vector.load %arg5[%c0, %c0_1] : memref<16x1xf32, #tpu.memory_space<vmem>>, vector<16x1xf32>
    %c0_2 = arith.constant 0 : index
    %c0_3 = arith.constant 0 : index
    %4 = vector.load %arg2[%c0_2, %c0_3] : memref<16x16xf32, #tpu.memory_space<vmem>>, vector<16x16xf32>
    %5 = vector.broadcast %3 : vector<16x1xf32> to vector<16x16xf32>
    %6 = arith.subf %4, %5 : vector<16x16xf32>
    %c0_4 = arith.constant 0 : index
    %c0_5 = arith.constant 0 : index
    %7 = vector.load %arg6[%c0_4, %c0_5] : memref<16x1xf32, #tpu.memory_space<vmem>>, vector<16x1xf32>
    %cst = arith.constant dense<0.000000e+00> : vector<16xf32>
    %8 = vector.multi_reduction <add>, %6, %cst [1] : vector<16x16xf32> to vector<16xf32>
    %9 = vector.shape_cast %8 : vector<16xf32> to vector<16x1xf32>
    %10 = arith.addf %7, %9 : vector<16x1xf32>
    %c0_6 = arith.constant 0 : index
    %c0_7 = arith.constant 0 : index
    %11 = vector.load %arg6[%c0_6, %c0_7] : memref<16x1xf32, #tpu.memory_space<vmem>>, vector<16x1xf32>
    tpu.vector_store %arg6[%c0_6, %c0_7], %10 {strides = array<i32>} : memref<16x1xf32, #tpu.memory_space<vmem>>, vector<16x1xf32>,
    %c0_8 = arith.constant 0 : index
    %c0_9 = arith.constant 0 : index
    %12 = vector.load %arg7[%c0_8, %c0_9] : memref<16x1xf32, #tpu.memory_space<vmem>>, vector<16x1xf32>
    %13 = arith.mulf %6, %6 : vector<16x16xf32>
    %cst_10 = arith.constant dense<0.000000e+00> : vector<16xf32>
    %14 = vector.multi_reduction <add>, %13, %cst_10 [1] : vector<16x16xf32> to vector<16xf32>
    %15 = vector.shape_cast %14 : vector<16xf32> to vector<16x1xf32>
    %16 = arith.addf %12, %15 : vector<16x1xf32>
    %c0_11 = arith.constant 0 : index
    %c0_12 = arith.constant 0 : index
    %17 = vector.load %arg7[%c0_11, %c0_12] : memref<16x1xf32, #tpu.memory_space<vmem>>, vector<16x1xf32>
    tpu.vector_store %arg7[%c0_11, %c0_12], %16 {strides = array<i32>} : memref<16x1xf32, #tpu.memory_space<vmem>>, vector<16x1xf32>,
    %c0_13 = arith.constant 0 : index
    %c0_14 = arith.constant 0 : index
    %18 = vector.load %arg8[%c0_13, %c0_14] : memref<16x1xf32, #tpu.memory_space<vmem>>, vector<16x1xf32>
    %c0_15 = arith.constant 0 : index
    %c0_16 = arith.constant 0 : index
    %19 = vector.load %arg3[%c0_15, %c0_16] : memref<16x16xf32, #tpu.memory_space<vmem>>, vector<16x16xf32>
    %20 = vector.broadcast %18 : vector<16x1xf32> to vector<16x16xf32>
    %21 = arith.subf %19, %20 : vector<16x16xf32>
    %c0_17 = arith.constant 0 : index
    %c0_18 = arith.constant 0 : index
    %22 = vector.load %arg9[%c0_17, %c0_18] : memref<16x1xf32, #tpu.memory_space<vmem>>, vector<16x1xf32>
    %cst_19 = arith.constant dense<0.000000e+00> : vector<16xf32>
    %23 = vector.multi_reduction <add>, %21, %cst_19 [1] : vector<16x16xf32> to vector<16xf32>
    %24 = vector.shape_cast %23 : vector<16xf32> to vector<16x1xf32>
    %25 = arith.addf %22, %24 : vector<16x1xf32>
    %c0_20 = arith.constant 0 : index
    %c0_21 = arith.constant 0 : index
    %26 = vector.load %arg9[%c0_20, %c0_21] : memref<16x1xf32, #tpu.memory_space<vmem>>, vector<16x1xf32>
    tpu.vector_store %arg9[%c0_20, %c0_21], %25 {strides = array<i32>} : memref<16x1xf32, #tpu.memory_space<vmem>>, vector<16x1xf32>,
    %c0_22 = arith.constant 0 : index
    %c0_23 = arith.constant 0 : index
    %27 = vector.load %arg10[%c0_22, %c0_23] : memref<16x1xf32, #tpu.memory_space<vmem>>, vector<16x1xf32>
    %28 = arith.mulf %21, %21 : vector<16x16xf32>
    %cst_24 = arith.constant dense<0.000000e+00> : vector<16xf32>
    %29 = vector.multi_reduction <add>, %28, %cst_24 [1] : vector<16x16xf32> to vector<16xf32>
    %30 = vector.shape_cast %29 : vector<16xf32> to vector<16x1xf32>
    %31 = arith.addf %27, %30 : vector<16x1xf32>
    %c0_25 = arith.constant 0 : index
    %c0_26 = arith.constant 0 : index
    %32 = vector.load %arg10[%c0_25, %c0_26] : memref<16x1xf32, #tpu.memory_space<vmem>>, vector<16x1xf32>
    tpu.vector_store %arg10[%c0_25, %c0_26], %31 {strides = array<i32>} : memref<16x1xf32, #tpu.memory_space<vmem>>, vector<16x1xf32>,
    %c0_i32_27 = arith.constant 0 : i32
    %33 = arith.cmpi eq, %arg1, %c0_i32_27 : i32
    %34 = arith.extui %33 : i1 to i32
    %c0_i32_28 = arith.constant 0 : i32
    %35 = arith.cmpi ne, %34, %c0_i32_28 : i32
    scf.if %35 {
      %c0_29 = arith.constant 0 : index
      %c0_30 = arith.constant 0 : index
      %36 = vector.load %arg6[%c0_29, %c0_30] : memref<16x1xf32, #tpu.memory_space<vmem>>, vector<16x1xf32>
      %c0_31 = arith.constant 0 : index
      %c0_32 = arith.constant 0 : index
      %37 = vector.load %arg7[%c0_31, %c0_32] : memref<16x1xf32, #tpu.memory_space<vmem>>, vector<16x1xf32>
      %38 = arith.mulf %36, %36 : vector<16x1xf32>
      %cst_33 = arith.constant 6.250000e-02 : f32
      %39 = vector.broadcast %cst_33 : f32 to vector<16x1xf32>
      %40 = arith.mulf %38, %39 : vector<16x1xf32>
      %41 = arith.subf %37, %40 : vector<16x1xf32>
      %cst_34 = arith.constant 0.0666666701 : f32
      %42 = vector.broadcast %cst_34 : f32 to vector<16x1xf32>
      %43 = arith.mulf %41, %42 : vector<16x1xf32>
      %cst_35 = arith.constant 0.000000e+00 : f32
      %44 = vector.broadcast %cst_35 : f32 to vector<16x1xf32>
      %45 = arith.maximumf %43, %44 : vector<16x1xf32>
      %c0_36 = arith.constant 0 : index
      %c0_37 = arith.constant 0 : index
      %46 = vector.load %arg9[%c0_36, %c0_37] : memref<16x1xf32, #tpu.memory_space<vmem>>, vector<16x1xf32>
      %c0_38 = arith.constant 0 : index
      %c0_39 = arith.constant 0 : index
      %47 = vector.load %arg10[%c0_38, %c0_39] : memref<16x1xf32, #tpu.memory_space<vmem>>, vector<16x1xf32>
      %48 = arith.mulf %46, %46 : vector<16x1xf32>
      %cst_40 = arith.constant 6.250000e-02 : f32
      %49 = vector.broadcast %cst_40 : f32 to vector<16x1xf32>
      %50 = arith.mulf %48, %49 : vector<16x1xf32>
      %51 = arith.subf %47, %50 : vector<16x1xf32>
      %cst_41 = arith.constant 0.0666666701 : f32
      %52 = vector.broadcast %cst_41 : f32 to vector<16x1xf32>
      %53 = arith.mulf %51, %52 : vector<16x1xf32>
      %cst_42 = arith.constant 0.000000e+00 : f32
      %54 = vector.broadcast %cst_42 : f32 to vector<16x1xf32>
      %55 = arith.maximumf %53, %54 : vector<16x1xf32>
      %56 = arith.addf %45, %55 : vector<16x1xf32>
      %cst_43 = arith.constant 9.99999993E-9 : f32
      %57 = vector.broadcast %cst_43 : f32 to vector<16x1xf32>
      %58 = arith.addf %56, %57 : vector<16x1xf32>
      %59 = arith.divf %55, %58 : vector<16x1xf32>
      %c0_44 = arith.constant 0 : index
      %c0_45 = arith.constant 0 : index
      %60 = vector.load %arg4[%c0_44, %c0_45] : memref<16x1xf32, #tpu.memory_space<vmem>>, vector<16x1xf32>
      tpu.vector_store %arg4[%c0_44, %c0_45], %59 {strides = array<i32>} : memref<16x1xf32, #tpu.memory_space<vmem>>, vector<16x1xf32>,
    } else {
    }
    return
  }
  func.func @transform_0(%arg0: i32, %arg1: i32) -> (i32, i32) {
    %c0_i32 = arith.constant 0 : i32
    return %arg0, %arg1 : i32, i32
  }
  func.func @transform_1(%arg0: i32, %arg1: i32) -> (i32, i32) {
    %c0_i32 = arith.constant 0 : i32
    return %arg0, %arg1 : i32, i32
  }
  func.func @transform_2(%arg0: i32, %arg1: i32) -> (i32, i32) {
    %c0_i32 = arith.constant 0 : i32
    %c0_i32_0 = arith.constant 0 : i32
    return %arg0, %c0_i32 : i32, i32
  }
}

</mosaic_0001>

<bundles_post_ra>
// kernel: _pallas_vardiv.1
= control target key start
LH: loop header
LB: loop body
LE: loop exit
PB: predicated region body
PF: predicated region fallthrough
CT: control target
= control target key end

     0   :  { %7 = vsyncpa [#allocation9], 0  ;;  %s312_s0 = inlined_call_operand.hbm [shape: f32[16,16], index: 0, kind: input, shape index: {}]   ;;  %s313_s1 = inlined_call_operand.hbm [shape: f32[16,16], index: 1, kind: input, shape index: {}]   ;;  %s314_s2 = inlined_call_operand.vmem [shape: f32[16,1], index: 2, kind: output, shape index: {}]  }
   0x1   :  { %8 = vsyncpa [#allocation11], 0  ;;  %s249_s9 = smov [#allocation8]  }
   0x2   :  { %s14_s10 = sshll.u32 %s249_s9, 4  ;;  %s15_s10 = int_to_ptr.vmem [resolvable:$true] %s14_s10 }
   0x3   :  { %s213_s11 = scalar_lea.vmem %s15_s10, 256  ;;  %p218_p1 = scmp.lt.s32.totalorder %s15_s10, %s15_s10 }
   0x4   :  { %p214_p0 = scmp.ne.s32.totalorder %s15_s10, %s213_s11  ;;  %p219_p2 = scmp.lt.s32.totalorder %s213_s11, %s213_s11 }
   0x6   :  { %p220_p3 = por %p219_p2, %p218_p1 }
   0x8   :  { %p221_p4 = pnand %p220_p3, %p214_p0 }
   0xa   :  { %224 = shalt.err (!%p221_p4)
}
   0xb   :  { %s250_s12 = smov 128   ;;  %s251_s13 = smov 8  }
   0xc   :  { %20 = dma.hbm_to_vmem [thread:$0]  %s312_s0, 256, %s15_s10, [#allocation9], %s250_s12, %s250_s12, %s251_s13  }
   0xd   :  { %s252_s16 = smov [#allocation10]  }
   0xe   :  { %s26_s17 = sshll.u32 %s252_s16, 4  ;;  %s27_s17 = int_to_ptr.vmem [resolvable:$true] %s26_s17 }
   0xf   :  { %s233_s18 = scalar_lea.vmem %s27_s17, 256  ;;  %p238_p6 = scmp.lt.s32.totalorder %s27_s17, %s27_s17 }
  0x10   :  { %p234_p5 = scmp.ne.s32.totalorder %s27_s17, %s233_s18  ;;  %p239_p7 = scmp.lt.s32.totalorder %s233_s18, %s233_s18 }
  0x12   :  { %p240_p8 = por %p239_p7, %p238_p6 }
  0x14   :  { %p241_p9 = pnand %p240_p8, %p234_p5 }
  0x16   :  { %244 = shalt.err (!%p241_p9)
}
  0x17   :  { %32 = dma.hbm_to_vmem [thread:$0]  %s313_s1, 256, %s27_s17, [#allocation11], %s250_s12, %s250_s12, %s251_s13  }
  0x18   :  { %245 = dma.done.wait [#allocation9], 256  }
  0x19   :  { %246 = vsyncadd [#allocation9], 4294967040 }
  0x1a   :  { %247 = dma.done.wait [#allocation11], 256  }
  0x1b   :  { %248 = vsyncadd [#allocation11], 4294967040  ;;  %v253_v0 = vmov 0   ;;  %vm45_vm0 = vcmask 7168   ;;  %v52_v1 = vld [vmem:[#allocation10] sm:$0xff]  ;;  %v43_v2 = vld [vmem:[#allocation8] sm:$0xff] }
  0x1c   :  { %200 = vset.pattern.permute.xlu1 %v253_v0  ;;  %199 = vset.pattern.permute.xlu0 %v253_v0  ;;  %v53_v3 = vld [vmem:[#allocation10 + $0x8] sm:$0xff]  ;;  %54 = vst.msk [vmem:[#allocation5] sm:$0xff] %vm45_vm0, %v52_v1  ;;  %46 = vst.msk [vmem:[#allocation2] sm:$0xff] %vm45_vm0, %v43_v2  ;;  %v44_v4 = vld [vmem:[#allocation8 + $0x8] sm:$0xff]  ;;  %v254_v9 = vmov 0.0   ;;  %vm78_vm1 = vcmask 130048  }
  0x1d   :  { %55 = vst.msk [vmem:[#allocation5 + $0x8] sm:$0xff] %vm45_vm0, %v53_v3  ;;  %47 = vst.msk [vmem:[#allocation2 + $0x8] sm:$0xff] %vm45_vm0, %v44_v4 }
  0x1e   :  { %48 = vst.msk [vmem:[#allocation3] sm:$0xff] %vm45_vm0, %v254_v9  ;;  %49 = vst.msk [vmem:[#allocation3 + $0x8] sm:$0xff] %vm45_vm0, %v254_v9 }
  0x1f   :  { %50 = vst.msk [vmem:[#allocation4] sm:$0xff] %vm45_vm0, %v254_v9  ;;  %51 = vst.msk [vmem:[#allocation4 + $0x8] sm:$0xff] %vm45_vm0, %v254_v9 }
  0x20   :  { %56 = vst.msk [vmem:[#allocation6] sm:$0xff] %vm45_vm0, %v254_v9  ;;  %57 = vst.msk [vmem:[#allocation6 + $0x8] sm:$0xff] %vm45_vm0, %v254_v9 }
  0x21   :  { %58 = vst.msk [vmem:[#allocation7] sm:$0xff] %vm45_vm0, %v254_v9  ;;  %59 = vst.msk [vmem:[#allocation7 + $0x8] sm:$0xff] %vm45_vm0, %v254_v9 }
  0x23   :  { %v104_v5 = vld [vmem:[#allocation5] sm:$0xff]  ;;  %v60_v6 = vld [vmem:[#allocation2] sm:$0xff] }
  0x24   :  { %110 = vperm.xlu1 %200, %v104_v5   ;;  %66 = vperm.xlu0 %199, %v60_v6   ;;  %v105_v7 = vld [vmem:[#allocation5 + $0x8] sm:$0xff]  ;;  %v61_v8 = vld [vmem:[#allocation2 + $0x8] sm:$0xff] }
  0x25   :  { %v76_v30 = vld [vmem:[#allocation3] sm:$0xff]  ;;  %v77_v33 = vld [vmem:[#allocation3 + $0x8] sm:$0xff] }
  0x26   :  { %v90_v39 = vld [vmem:[#allocation4] sm:$0xff]  ;;  %v91_v47 = vld [vmem:[#allocation4 + $0x8] sm:$0xff] }
  0x27   :  { %v120_v34 = vld [vmem:[#allocation6] sm:$0xff]  ;;  %v121_v40 = vld [vmem:[#allocation6 + $0x8] sm:$0xff] }
  0x28   :  { %115 = vperm.xlu1 %200, %v105_v7   ;;  %71 = vperm.xlu0 %199, %v61_v8   ;;  %v132_v46 = vld [vmem:[#allocation7] sm:$0xff]  ;;  %v133_v55 = vld [vmem:[#allocation7 + $0x8] sm:$0xff] }
  0x9f   :  { %v111_v10 = vpop.permute.xlu1 %110  ;;  %v67_v11 = vpop.permute.xlu0 %66 }
  0xa0   :  { %v118_v12 = vsub.f32 %v52_v1, %v111_v10  ;;  %v74_v13 = vsub.f32 %v43_v2, %v67_v11 }
  0xa2   :  { %v79_v14 = vsel %vm78_vm1, %v74_v13, 0.0  ;;  %v122_v18 = vsel %vm78_vm1, %v118_v12, 0.0  ;;  %v92_v21 = vmul.f32 %v74_v13, %v74_v13  ;;  %v134_v25 = vmul.f32 %v118_v12, %v118_v12 }
  0xa3   :  { %v116_v15 = vpop.permute.xlu1 %115  ;;  %80 = vadd.xlane.f32.xlu0 %v79_v14  ;;  %v72_v16 = vpop.permute.xlu0 %71 }
  0xa4   :  { %v75_v17 = vsub.f32 %v44_v4, %v72_v16  ;;  %v119_v19 = vsub.f32 %v53_v3, %v116_v15  ;;  %v94_v23 = vsel %vm78_vm1, %v92_v21, 0.0  ;;  %v136_v27 = vsel %vm78_vm1, %v134_v25, 0.0 }
  0xa6   :  { %v82_v20 = vsel %vm78_vm1, %v75_v17, 0.0  ;;  %v125_v22 = vsel %vm78_vm1, %v119_v19, 0.0  ;;  %v93_v24 = vmul.f32 %v75_v17, %v75_v17  ;;  %v135_v28 = vmul.f32 %v119_v19, %v119_v19 }
  0xa7   :  { %123 = vadd.xlane.f32.xlu0 %v122_v18  ;;  %83 = vadd.xlane.f32.xlu1 %v82_v20 }
  0xa8   :  { %v97_v26 = vsel %vm78_vm1, %v93_v24, 0.0  ;;  %v139_v29 = vsel %vm78_vm1, %v135_v28, 0.0 }
  0xab   :  { %126 = vadd.xlane.f32.xlu0 %v125_v22  ;;  %95 = vadd.xlane.f32.xlu1 %v94_v23 }
  0xaf   :  { %98 = vadd.xlane.f32.xlu0 %v97_v26  ;;  %137 = vadd.xlane.f32.xlu1 %v136_v27 }
  0xb3   :  { %140 = vadd.xlane.f32.xlu0 %v139_v29 }
 0x12c   :  { %v81_v31 = vpop.xlane.xlu0 %80 }
 0x12d   :  { %v85_v32 = vadd.f32 %v81_v31, %v76_v30 }
 0x12f   :  { %88 = vst.msk [vmem:[#allocation3] sm:$0xff] %vm45_vm0, %v85_v32 }
 0x130   :  { %v84_v35 = vpop.xlane.xlu1 %83  ;;  %v124_v36 = vpop.xlane.xlu0 %123 }
 0x131   :  { %v86_v37 = vadd.f32 %v84_v35, %v77_v33  ;;  %v128_v38 = vadd.f32 %v124_v36, %v120_v34 }
 0x133   :  { %89 = vst.msk [vmem:[#allocation3 + $0x8] sm:$0xff] %vm45_vm0, %v86_v37  ;;  %130 = vst.msk [vmem:[#allocation6] sm:$0xff] %vm45_vm0, %v128_v38 }
 0x134   :  { %v96_v41 = vpop.xlane.xlu1 %95  ;;  %v127_v42 = vpop.xlane.xlu0 %126 }
 0x135   :  { %v100_v43 = vadd.f32 %v96_v41, %v90_v39  ;;  %v129_v44 = vadd.f32 %v127_v42, %v121_v40 }
 0x136   :  { %v149_v45 = vld [vmem:[#allocation3] sm:$0xff] }
 0x137   :  { %102 = vst.msk [vmem:[#allocation4] sm:$0xff] %vm45_vm0, %v100_v43  ;;  %131 = vst.msk [vmem:[#allocation6 + $0x8] sm:$0xff] %vm45_vm0, %v129_v44  ;;  %v153_v50 = vmul.f32 %v149_v45, %v149_v45 }
 0x138   :  { %v138_v48 = vpop.xlane.xlu1 %137  ;;  %v99_v49 = vpop.xlane.xlu0 %98 }
 0x139   :  { %v142_v51 = vadd.f32 %v138_v48, %v132_v46  ;;  %v101_v52 = vadd.f32 %v99_v49, %v91_v47  ;;  %v155_v57 = vmul.f32 0.0625, %v153_v50 }
 0x13a   :  { %v150_v53 = vld [vmem:[#allocation3 + $0x8] sm:$0xff]  ;;  %v163_v54 = vld [vmem:[#allocation6] sm:$0xff] }
 0x13b   :  { %144 = vst.msk [vmem:[#allocation7] sm:$0xff] %vm45_vm0, %v142_v51  ;;  %103 = vst.msk [vmem:[#allocation4 + $0x8] sm:$0xff] %vm45_vm0, %v101_v52  ;;  %v154_v58 = vmul.f32 %v150_v53, %v150_v53  ;;  %v167_v59 = vmul.f32 %v163_v54, %v163_v54 }
 0x13c   :  { %v141_v56 = vpop.xlane.xlu0 %140 }
 0x13d   :  { %v143_v60 = vadd.f32 %v141_v56, %v133_v55  ;;  %v156_v0 = vmul.f32 0.0625, %v154_v58  ;;  %v169_v1 = vmul.f32 0.0625, %v167_v59 }
 0x13e   :  { %v151_v61 = vld [vmem:[#allocation4] sm:$0xff]  ;;  %v164_v62 = vld [vmem:[#allocation6 + $0x8] sm:$0xff] }
 0x13f   :  { %v157_v63 = vsub.f32 %v151_v61, %v155_v57  ;;  %145 = vst.msk [vmem:[#allocation7 + $0x8] sm:$0xff] %vm45_vm0, %v143_v60  ;;  %v168_v2 = vmul.f32 %v164_v62, %v164_v62 }
 0x141   :  { %v159_v5 = vmul.f32 0.06666667, %v157_v63  ;;  %v170_v8 = vmul.f32 0.0625, %v168_v2 }
 0x142   :  { %v165_v3 = vld [vmem:[#allocation7] sm:$0xff]  ;;  %v152_v4 = vld [vmem:[#allocation4 + $0x8] sm:$0xff] }
 0x143   :  { %v171_v6 = vsub.f32 %v165_v3, %v169_v1  ;;  %v158_v7 = vsub.f32 %v152_v4, %v156_v0  ;;  %v161_v11 = vmax.f32 %v159_v5, 0.0 }
 0x145   :  { %v173_v9 = vmul.f32 0.06666667, %v171_v6  ;;  %v160_v13 = vmul.f32 0.06666667, %v158_v7 }
 0x146   :  { %v166_v10 = vld [vmem:[#allocation7 + $0x8] sm:$0xff] }
 0x147   :  { %v175_v12 = vmax.f32 %v173_v9, 0.0  ;;  %v172_v14 = vsub.f32 %v166_v10, %v170_v8  ;;  %v162_v18 = vmax.f32 %v160_v13, 0.0 }
 0x149   :  { %v177_v15 = vadd.f32 %v175_v12, %v161_v11  ;;  %v174_v16 = vmul.f32 0.06666667, %v172_v14 }
 0x14b   :  { %v179_v17 = vadd.f32 1e-08, %v177_v15  ;;  %v176_v19 = vmax.f32 %v174_v16, 0.0 }
 0x14d   :  { %201 = vrcp.f32 %v179_v17  ;;  %v178_v20 = vadd.f32 %v176_v19, %v162_v18 }
 0x14f   :  { %v180_v21 = vadd.f32 1e-08, %v178_v20 }
 0x151   :  { %203 = vrcp.f32 %v180_v21 }
 0x15a   :  { %v202_v22 = vpop.eup %201 }
 0x15b   :  { %v182_v23 = vmul.f32 %v202_v22, %v175_v12 }
 0x15d   :  { %185 = vst.msk [vmem:[%s314_s2] sm:$0xff] %vm45_vm0, %v182_v23 }
 0x15e   :  { %v204_v24 = vpop.eup %203 }
 0x15f   :  { %v184_v25 = vmul.f32 %v204_v24, %v176_v19 }
 0x161   :  { %186 = vst.msk [vmem:[%s314_s2 + $0x8] sm:$0xff] %vm45_vm0, %v184_v25 }
 0x162   :  { %191 = vsyncpa [#allocation9], 1 }
 0x163   :  { %192 = vsyncpa [#allocation11], 1 }

</bundles_post_ra>
